<compile_context>
chip_gen: v6e
topology: v6e:2x2x1
jax: 0.10.0
libtpu: 0.0.40
codegen_flags: <defaults>
</compile_context>

<pallas_src>
import functools

import jax
import jax.numpy as jnp
from jax import lax
from jax.experimental import pallas as pl
from jax.experimental.pallas import tpu as pltpu


def _contrastive_kernel(x1_ref, x2_ref, label_ref, out_ref, acc_ref, *,
                        margin, batch, tile_b):
    i = pl.program_id(0)

    @pl.when(i == 0)
    def _init():
        acc_ref[...] = jnp.zeros_like(acc_ref)

    # F.pairwise_distance: d = || x1 - x2 + eps ||_2 along last dim, eps=1e-6
    eps = jnp.float32(1e-6)
    x1 = x1_ref[...].astype(jnp.float32)
    x2 = x2_ref[...].astype(jnp.float32)
    diff = x1 - x2 + eps
    d2 = jnp.sum(diff * diff, axis=-1, keepdims=True)        # (tile_b, 1)
    d = jnp.sqrt(d2)                                          # euclidean distance
    lab = label_ref[...].astype(jnp.float32)                  # (tile_b, 1)
    hinge = jnp.maximum(jnp.float32(margin) - d, 0.0)         # clamp(margin - d, 0)
    per_pair = (1.0 - lab) * d2 + lab * hinge * hinge         # (tile_b, 1)

    # Mask padded tail rows of the last (ragged) tile out of the sum.
    row = i * tile_b + lax.broadcasted_iota(jnp.int32, per_pair.shape, 0)
    per_pair = jnp.where(row < batch, per_pair, 0.0)

    acc_ref[...] += jnp.sum(per_pair, keepdims=True)          # (1, 1) running sum

    @pl.when(i == pl.num_programs(0) - 1)
    def _finalize():
        out_ref[...] = acc_ref[...] * jnp.float32(1.0 / batch)


def _pick_tile_b(batch, feat_dim, itemsize):
    # ~2 MiB per input tile: with 2 inputs x 2 pipeline buffers this is ~8 MiB
    # of VMEM, safe even on v5e's 16 MiB default scoped limit, while being big
    # enough to amortize the ~0.35 us per-grid-step overhead.
    target_bytes = 2 * 1024 * 1024
    tile_b = target_bytes // max(1, feat_dim * itemsize)
    tile_b = max(8, (tile_b // 8) * 8)          # sublane multiple of 8
    padded_b = max(8, ((batch + 7) // 8) * 8)   # never bigger than padded batch
    tile_b = min(tile_b, padded_b, 4096)
    return int(tile_b)


def contrastive_loss(output1, output2, label, margin=2.0, *, tile_b=None):
    """Pallas TPU implementation of ContrastiveLoss.forward (returns a scalar)."""
    assert output1.shape == output2.shape and output1.ndim == 2
    B, D = output1.shape
    label = label.reshape(B, 1)

    itemsize = jnp.dtype(output1.dtype).itemsize
    if tile_b is None:
        tile_b = _pick_tile_b(B, D, itemsize)
    grid = (pl.cdiv(B, tile_b),)

    kernel = functools.partial(
        _contrastive_kernel, margin=float(margin), batch=B, tile_b=tile_b)

    bytes_accessed = 2 * B * D * itemsize + B * jnp.dtype(label.dtype).itemsize + 4
    cost = pl.CostEstimate(
        flops=8 * B * D, transcendentals=B, bytes_accessed=int(bytes_accessed))

    out = pl.pallas_call(
        kernel,
        out_shape=jax.ShapeDtypeStruct((1, 1), jnp.float32),
        grid_spec=pltpu.PrefetchScalarGridSpec(
            num_scalar_prefetch=0,
            grid=grid,
            in_specs=[
                pl.BlockSpec((tile_b, D), lambda i: (i, 0)),
                pl.BlockSpec((tile_b, D), lambda i: (i, 0)),
                pl.BlockSpec((tile_b, 1), lambda i: (i, 0)),
            ],
            # Whole (1,1) output stays resident; written once at the last step.
            out_specs=pl.BlockSpec(memory_space=pltpu.VMEM),
            scratch_shapes=[pltpu.VMEM((1, 1), jnp.float32)],
        ),
        compiler_params=pltpu.CompilerParams(
            dimension_semantics=("arbitrary",),
            vmem_limit_bytes=32 * 1024 * 1024,
        ),
        cost_estimate=cost,
    )(output1, output2, label)
    return out[0, 0]


def _reference(output1, output2, label, margin=2.0):
    # Plain-JAX mirror of the PyTorch forward, for a sanity check.
    eps = 1e-6
    d = jnp.sqrt(jnp.sum((output1 - output2 + eps) ** 2, axis=-1, keepdims=True))
    lab = label.reshape(-1, 1)
    return jnp.mean((1.0 - lab) * d ** 2 + lab * jnp.maximum(margin - d, 0.0) ** 2)


if __name__ == "__main__":
    key = jax.random.PRNGKey(0)
    k1, k2, k3 = jax.random.split(key, 3)

    # Small shapes consistent with the module's forward contract.
    B, D = 8, 32
    output1 = jax.random.normal(k1, (B, D), dtype=jnp.float32)
    output2 = jax.random.normal(k2, (B, D), dtype=jnp.float32)
    label = jax.random.bernoulli(k3, 0.5, (B, 1)).astype(jnp.float32)

    loss = contrastive_loss(output1, output2, label, margin=2.0)
    jax.block_until_ready(loss)
    ref = _reference(output1, output2, label, margin=2.0)
    assert jnp.allclose(loss, ref, rtol=1e-5, atol=1e-5), (loss, ref)

    # Exercise the multi-tile + ragged-tail (masked) path explicitly.
    B2, D2 = 50, 32
    kk1, kk2, kk3 = jax.random.split(jax.random.PRNGKey(1), 3)
    o1 = jax.random.normal(kk1, (B2, D2), dtype=jnp.float32)
    o2 = jax.random.normal(kk2, (B2, D2), dtype=jnp.float32)
    lab2 = jax.random.bernoulli(kk3, 0.5, (B2, 1)).astype(jnp.float32)
    loss2 = contrastive_loss(o1, o2, lab2, margin=2.0, tile_b=8)
    jax.block_until_ready(loss2)
    ref2 = _reference(o1, o2, lab2, margin=2.0)
    assert jnp.allclose(loss2, ref2, rtol=1e-5, atol=1e-5), (loss2, ref2)

    print("KERNEL_OK")
</pallas_src>

<mosaic_0001>
module attributes {stable_mosaic.version = 11 : i64} {
  func.func @_contrastive_kernel(%arg0: i32, %arg1: memref<8x32xf32, #tpu.memory_space<vmem>>, %arg2: memref<8x32xf32, #tpu.memory_space<vmem>>, %arg3: memref<8x1xf32, #tpu.memory_space<vmem>>, %arg4: memref<1x1xf32, #tpu.memory_space<vmem>>, %arg5: memref<1x1xf32, #tpu.memory_space<vmem>>) attributes {dimension_semantics = [#tpu.dimension_semantics<arbitrary>], iteration_bounds = array<i64: 1>, scalar_prefetch = 0 : i64, scratch_operands = 1 : i64, tpu.core_type = #tpu.core_type<tc>, window_params = [{transform_indices = @transform_0, window_bounds = array<i64: 8, 32>}, {transform_indices = @transform_1, window_bounds = array<i64: 8, 32>}, {transform_indices = @transform_2, window_bounds = array<i64: 8, 1>}, {pipeline_mode = #tpu.pipeline_mode<synchronous>, transform_indices = @transform_3, window_bounds = array<i64: 1, 1>}]} {
    %c0_i32 = arith.constant 0 : i32
    %0 = arith.cmpi eq, %arg0, %c0_i32 : i32
    %1 = arith.extui %0 : i1 to i32
    %c0_i32_0 = arith.constant 0 : i32
    %2 = arith.cmpi ne, %1, %c0_i32_0 : i32
    scf.if %2 {
      %cst_19 = arith.constant 0.000000e+00 : f32
      %42 = vector.broadcast %cst_19 : f32 to vector<1x1xf32>
      %c0_20 = arith.constant 0 : index
      %c0_21 = arith.constant 0 : index
      %43 = vector.load %arg5[%c0_20, %c0_21] : memref<1x1xf32, #tpu.memory_space<vmem>>, vector<1x1xf32>
      tpu.vector_store %arg5[%c0_20, %c0_21], %42 {strides = array<i32>} : memref<1x1xf32, #tpu.memory_space<vmem>>, vector<1x1xf32>,
    } else {
    }
    %c0 = arith.constant 0 : index
    %c0_1 = arith.constant 0 : index
    %3 = vector.load %arg1[%c0, %c0_1] : memref<8x32xf32, #tpu.memory_space<vmem>>, vector<8x32xf32>
    %c0_2 = arith.constant 0 : index
    %c0_3 = arith.constant 0 : index
    %4 = vector.load %arg2[%c0_2, %c0_3] : memref<8x32xf32, #tpu.memory_space<vmem>>, vector<8x32xf32>
    %5 = arith.subf %3, %4 : vector<8x32xf32>
    %cst = arith.constant 9.99999997E-7 : f32
    %6 = vector.broadcast %cst : f32 to vector<8x32xf32>
    %7 = arith.addf %5, %6 : vector<8x32xf32>
    %8 = arith.mulf %7, %7 : vector<8x32xf32>
    %cst_4 = arith.constant dense<0.000000e+00> : vector<8xf32>
    %9 = vector.multi_reduction <add>, %8, %cst_4 [1] : vector<8x32xf32> to vector<8xf32>
    %10 = vector.shape_cast %9 : vector<8xf32> to vector<8x1xf32>
    %11 = math.sqrt %10 : vector<8x1xf32>
    %c0_5 = arith.constant 0 : index
    %c0_6 = arith.constant 0 : index
    %12 = vector.load %arg3[%c0_5, %c0_6] : memref<8x1xf32, #tpu.memory_space<vmem>>, vector<8x1xf32>
    %cst_7 = arith.constant 2.000000e+00 : f32
    %13 = vector.broadcast %cst_7 : f32 to vector<8x1xf32>
    %14 = arith.subf %13, %11 : vector<8x1xf32>
    %cst_8 = arith.constant 0.000000e+00 : f32
    %15 = vector.broadcast %cst_8 : f32 to vector<8x1xf32>
    %16 = arith.maximumf %14, %15 : vector<8x1xf32>
    %cst_9 = arith.constant 1.000000e+00 : f32
    %17 = vector.broadcast %cst_9 : f32 to vector<8x1xf32>
    %18 = arith.subf %17, %12 : vector<8x1xf32>
    %19 = arith.mulf %18, %10 : vector<8x1xf32>
    %20 = arith.mulf %12, %16 : vector<8x1xf32>
    %21 = arith.mulf %20, %16 : vector<8x1xf32>
    %22 = arith.addf %19, %21 : vector<8x1xf32>
    %c8_i32 = arith.constant 8 : i32
    %23 = arith.muli %arg0, %c8_i32 : i32
    %24 = tpu.iota {dimensions = array<i32: 0>} : vector<8x1xi32>
    %25 = vector.broadcast %23 : i32 to vector<8x1xi32>
    %26 = arith.addi %25, %24 : vector<8x1xi32>
    %c8_i32_10 = arith.constant 8 : i32
    %27 = vector.broadcast %c8_i32_10 : i32 to vector<8x1xi32>
    %28 = arith.cmpi slt, %26, %27 : vector<8x1xi32>
    %cst_11 = arith.constant 0.000000e+00 : f32
    %29 = vector.broadcast %cst_11 : f32 to vector<8x1xf32>
    %30 = arith.select %28, %22, %29 : vector<8x1xi1>, vector<8x1xf32>
    %c0_12 = arith.constant 0 : index
    %c0_13 = arith.constant 0 : index
    %31 = vector.load %arg5[%c0_12, %c0_13] : memref<1x1xf32, #tpu.memory_space<vmem>>, vector<1x1xf32>
    %32 = vector.shape_cast %30 : vector<8x1xf32> to vector<1x8x1xf32>
    %cst_14 = arith.constant dense<0.000000e+00> : vector<1xf32>
    %33 = vector.multi_reduction <add>, %32, %cst_14 [1, 2] : vector<1x8x1xf32> to vector<1xf32>
    %34 = vector.shape_cast %33 : vector<1xf32> to vector<1x1x1xf32>
    %35 = vector.extract %34[0, 0, 0] : f32 from vector<1x1x1xf32>
    %36 = vector.broadcast %35 : f32 to vector<1x1xf32>
    %37 = arith.addf %31, %36 : vector<1x1xf32>
    %c0_15 = arith.constant 0 : index
    %c0_16 = arith.constant 0 : index
    %38 = vector.load %arg5[%c0_15, %c0_16] : memref<1x1xf32, #tpu.memory_space<vmem>>, vector<1x1xf32>
    tpu.vector_store %arg5[%c0_15, %c0_16], %37 {strides = array<i32>} : memref<1x1xf32, #tpu.memory_space<vmem>>, vector<1x1xf32>,
    %c0_i32_17 = arith.constant 0 : i32
    %39 = arith.cmpi eq, %arg0, %c0_i32_17 : i32
    %40 = arith.extui %39 : i1 to i32
    %c0_i32_18 = arith.constant 0 : i32
    %41 = arith.cmpi ne, %40, %c0_i32_18 : i32
    scf.if %41 {
      %c0_19 = arith.constant 0 : index
      %c0_20 = arith.constant 0 : index
      %42 = vector.load %arg5[%c0_19, %c0_20] : memref<1x1xf32, #tpu.memory_space<vmem>>, vector<1x1xf32>
      %cst_21 = arith.constant 1.250000e-01 : f32
      %43 = vector.broadcast %cst_21 : f32 to vector<1x1xf32>
      %44 = arith.mulf %42, %43 : vector<1x1xf32>
      %c0_22 = arith.constant 0 : index
      %c0_23 = arith.constant 0 : index
      %45 = vector.load %arg4[%c0_22, %c0_23] : memref<1x1xf32, #tpu.memory_space<vmem>>, vector<1x1xf32>
      tpu.vector_store %arg4[%c0_22, %c0_23], %44 {strides = array<i32>} : memref<1x1xf32, #tpu.memory_space<vmem>>, vector<1x1xf32>,
    } else {
    }
    return
  }
  func.func @transform_0(%arg0: i32) -> (i32, i32) {
    %c0_i32 = arith.constant 0 : i32
    %c0_i32_0 = arith.constant 0 : i32
    return %arg0, %c0_i32 : i32, i32
  }
  func.func @transform_1(%arg0: i32) -> (i32, i32) {
    %c0_i32 = arith.constant 0 : i32
    %c0_i32_0 = arith.constant 0 : i32
    return %arg0, %c0_i32 : i32, i32
  }
  func.func @transform_2(%arg0: i32) -> (i32, i32) {
    %c0_i32 = arith.constant 0 : i32
    %c0_i32_0 = arith.constant 0 : i32
    return %arg0, %c0_i32 : i32, i32
  }
  func.func @transform_3(%arg0: i32) -> (i32, i32) {
    %c0_i32 = arith.constant 0 : i32
    %c0_i32_0 = arith.constant 0 : i32
    %c0_i32_1 = arith.constant 0 : i32
    return %c0_i32, %c0_i32_0 : i32, i32
  }
}

</mosaic_0001>

<bundles_post_ra>
// kernel: tpu_custom_call.1
= control target key start
LH: loop header
LB: loop body
LE: loop exit
PB: predicated region body
PF: predicated region fallthrough
CT: control target
= control target key end

     0   :  { %8 = vsyncpa [#allocation4], 0  ;;  %s190_s0 = inlined_call_operand.vmem [shape: f32[8,32], index: 0, kind: input, shape index: {}]   ;;  %s191_s1 = inlined_call_operand.hbm [shape: f32[8,32], index: 1, kind: input, shape index: {}]   ;;  %s192_s2 = inlined_call_operand.vmem [shape: f32[8,1], index: 2, kind: input, shape index: {}]   ;;  %s193_s3 = inlined_call_operand.hbm [shape: f32[1,1], index: 3, kind: output, shape index: {}]  }
   0x1   :  { %9 = vsyncpa [#allocation5], 0  ;;  %s152_s12 = smov [#allocation3]  }
   0x2   :  { %s18_s13 = sshll.u32 %s152_s12, 4  ;;  %s19_s13 = int_to_ptr.vmem [resolvable:$true] %s18_s13 }
   0x3   :  { %s116_s14 = scalar_lea.vmem %s19_s13, 128  ;;  %p121_p1 = scmp.lt.s32.totalorder %s19_s13, %s19_s13 }
   0x4   :  { %p117_p0 = scmp.ne.s32.totalorder %s19_s13, %s116_s14  ;;  %p122_p2 = scmp.lt.s32.totalorder %s116_s14, %s116_s14 }
   0x6   :  { %p123_p3 = por %p122_p2, %p121_p1 }
   0x8   :  { %p124_p4 = pnand %p123_p3, %p117_p0 }
   0xa   :  { %127 = shalt.err (!%p124_p4)
}
   0xb   :  { %21 = dma.hbm_to_vmem [thread:$0]  %s191_s1, 128, %s19_s13, [#allocation4]  }
   0xc   :  { %148 = dma.done.wait [#allocation4], 128  }
   0xd   :  { %149 = vsyncadd [#allocation4], 4294967168  ;;  %v33_v0 = vld [vmem:[%s190_s0] sm:$0xff]  ;;  %vm38_vm0 = vcmask 261120   ;;  %vm65_vm3 = vcmask 7168   ;;  %vm31_vm4 = vcmask 0  }
   0xe   :  { %v34_v1 = vld [vmem:[#allocation3] sm:$0xff]  ;;  %v153_v21 = vmov 0.0  }
   0xf   :  { %v35_v2 = vsub.f32 %v33_v0, %v34_v1  ;;  %v49_v12 = vld [vmem:[%s192_s2] sm:$0xff]  ;;  %32 = vst.msk [vmem:[#allocation2] sm:$0x1] %vm31_vm4, %v153_v21  ;;  %s154_s2 = smov [#allocation6]  }
  0x10   :  { %v52_v15 = vsub.f32 1.0, %v49_v12  ;;  %s92_s20 = sshll.u32 %s154_s2, 4  ;;  %s93_s20 = int_to_ptr.vmem [resolvable:$true] %s92_s20 }
  0x11   :  { %v36_v3 = vadd.f32 1e-06, %v35_v2  ;;  %s128_s21 = scalar_lea.vmem %s93_s20, 16  ;;  %s132_s22 = scalar_lea.vmem %s93_s20, 32 }
  0x12   :  { %p129_p5 = scmp.ne.s32.totalorder %s93_s20, %s128_s21  ;;  %p133_p6 = scmp.lt.s32.totalorder %s93_s20, %s93_s20 }
  0x13   :  { %v37_v4 = vmul.f32 %v36_v3, %v36_v3  ;;  %p134_p7 = scmp.lt.s32.totalorder %s132_s22, %s128_s21 }
  0x15   :  { %v39_v5 = vsel %vm38_vm0, %v37_v4, 0.0  ;;  %p135_p8 = por %p134_p7, %p133_p6 }
  0x16   :  { %40 = vadd.xlane.f32.xlu0 %v39_v5  ;;  %v64_v29 = vld [vmem:[#allocation2] sm:$0x1] }
  0x17   :  { %p136_p9 = pnand %p135_p8, %p129_p5 }
  0x9f   :  { %v41_v6 = vpop.xlane.xlu0 %40 }
  0xa0   :  { %106 = vrsqrt.f32 %v41_v6  ;;  %vm44_vm1 = vcmp.eq.f32.partialorder %v41_v6, inf  ;;  %v47_v9 = vand.u32 2147483648, %v41_v6  ;;  %vm46_vm2 = vcmp.eq.f32.partialorder %v41_v6, 0.0 }
  0xa1   :  { %v53_v17 = vmul.f32 %v52_v15, %v41_v6 }
  0xad   :  { %v107_v7 = vpop.eup %106 }
  0xae   :  { %v43_v8 = vmul.f32 %v107_v7, %v41_v6 }
  0xb0   :  { %v45_v10 = vsel %vm44_vm1, %v41_v6, %v43_v8 }
  0xb1   :  { %v48_v11 = vsel %vm46_vm2, %v47_v9, %v45_v10 }
  0xb2   :  { %v50_v13 = vsub.f32 2.0, %v48_v11 }
  0xb4   :  { %v51_v14 = vmax.f32 %v50_v13, 0.0 }
  0xb6   :  { %v54_v16 = vmul.f32 %v51_v14, %v49_v12 }
  0xb8   :  { %v55_v18 = vmul.f32 %v54_v16, %v51_v14 }
  0xba   :  { %v56_v19 = vadd.f32 %v55_v18, %v53_v17 }
  0xbc   :  { %v66_v20 = vsel %vm65_vm3, %v56_v19, 0.0 }
  0xbd   :  { %67 = vadd.xlane.f32.xlu0 %v66_v20 }
 0x146   :  { %v68_v22 = vpop.xlane.xlu0 %67 }
 0x147   :  { %v69_v23 = vrot.slane %v68_v22, 4 }
 0x149   :  { %v70_v24 = vadd.f32 %v69_v23, %v68_v22 }
 0x14b   :  { %v71_v25 = vrot.slane %v70_v24, 2 }
 0x14d   :  { %v72_v26 = vadd.f32 %v71_v25, %v70_v24 }
 0x14f   :  { %v73_v27 = vrot.slane %v72_v26, 1 }
 0x151   :  { %v74_v28 = vadd.f32 %v73_v27, %v72_v26 }
 0x153   :  { %101 = vpush %v74_v28 }
 0x184   :  { %s102_s0 = spop %101 }
 0x185   :  { %v76_v30 = vstv %s102_s0 }
 0x186   :  { %v77_v31 = vadd.f32 %v76_v30, %v64_v29 }
 0x188   :  { %79 = vst.msk [vmem:[#allocation2] sm:$0x1] %vm31_vm4, %v77_v31 }
 0x18f   :  { %v83_v32 = vld [vmem:[#allocation2] sm:$0x1] }
 0x190   :  { %v84_v33 = vmul.f32 0.125, %v83_v32 }
 0x192   :  { %85 = vst.msk [vmem:[#allocation6] sm:$0x1] %vm31_vm4, %v84_v33 }
 0x193   :  { %139 = shalt.err (!%p136_p9)
}
 0x194   :  { %95 = dma.vmem_to_hbm [thread:$0]  %s93_s20, 16, %s193_s3, [#allocation5]  }
 0x195   :  { %150 = dma.done.wait [#allocation5], 16  }
 0x196   :  { %151 = vsyncadd [#allocation5], 4294967280 }
 0x197   :  { %99 = vsyncpa [#allocation4], 1 }
 0x198   :  { %100 = vsyncpa [#allocation5], 1 }

</bundles_post_ra>
